<compile_context>
chip_gen: v7x
topology: tpu7x:2x2x1
jax: 0.10.0
libtpu: 0.0.40
codegen_flags: <defaults>
</compile_context>

<pallas_src>
import functools

import jax
import jax.numpy as jnp
from jax.experimental import pallas as pl
from jax.experimental.pallas import tpu as pltpu

EPS = 1e-5  # PyTorch nn.LayerNorm default eps


def _gelu(x):
    # TODO(synk): PyTorch nn.GELU() is the exact erf-based GELU; the tanh
    # approximation is used because erf lowering in Mosaic is not guaranteed
    # (max abs deviation ~1e-3, semantics otherwise identical).
    c = 0.7978845608028654  # sqrt(2/pi)
    return 0.5 * x * (1.0 + jnp.tanh(c * (x + 0.044715 * x * x * x)))


def _layernorm(x, g, b):
    mu = jnp.mean(x, axis=-1, keepdims=True)
    var = jnp.mean(jnp.square(x - mu), axis=-1, keepdims=True)
    return (x - mu) * jax.lax.rsqrt(var + EPS) * g + b


# ----------------------------------------------------------------------------
# Kernel: one (batch-block, layer) grid step.
# ----------------------------------------------------------------------------
def gmlp_kernel(patches_hbm, w_pe_hbm, glob_ref,
                w_in_ref, lslab_ref, sgu_w_ref, sgu_bias_ref, w_out_ref,
                w_cls_hbm,
                out_ref,
                x_acc, mix_scr,
                *, BT, N, P, dim, half, ncls_pad, compute_dtype):
    b = pl.program_id(0)
    l = pl.program_id(1)
    nl = pl.num_programs(1)
    cdt = compute_dtype

    # --- init: patch embedding, only at the first layer step of this block ----
    # patches / w_pe stay in HBM; copy just-in-time into scoped staging VMEM.
    @pl.when(l == 0)
    def _init():
        b_pe = glob_ref[...][0:1, :dim]

        def body(pbuf, wbuf):
            pltpu.sync_copy(patches_hbm.at[pl.ds(b * (BT * N), BT * N)], pbuf)
            pltpu.sync_copy(w_pe_hbm, wbuf)
            x_acc[...] = (jnp.dot(pbuf[...], wbuf[...],
                                  preferred_element_type=jnp.float32) + b_pe)

        pl.run_scoped(body,
                      pltpu.VMEM((BT * N, P), cdt),
                      pltpu.VMEM((P, dim), cdt))

    # --- per-layer small-vector slab ------------------------------------------
    slab = lslab_ref[...]                      # (8, 2*half) f32
    ln1_g = slab[0:1, :dim]
    ln1_b = slab[1:2, :dim]
    b_in = slab[2:3, :]                        # (1, 2*half)
    sgu_g = slab[3:4, :half]
    sgu_b = slab[4:5, :half]
    b_out = slab[5:6, :dim]

    # --- gMLP block -------------------------------------------------------------
    x = x_acc[...]                             # (BT*N, dim) f32 residual stream
    y = _layernorm(x, ln1_g, ln1_b)

    # fused proj_in: [dim, 2*half]; chunk(2,-1) -> first half = res, second = gate
    u = _gelu(jnp.dot(y.astype(cdt), w_in_ref[...],
                      preferred_element_type=jnp.float32) + b_in)
    res = u[:, :half]
    gate = _layernorm(u[:, half:], sgu_g, sgu_b).astype(cdt)   # cast once

    # Spatial Gating Unit (heads=1): per-image token mixing W[N,N] @ gate[N,half].
    # Each mixed block is written straight into a VMEM scratch row-range
    # (no concatenate, bounded live ranges).
    w_s = sgu_w_ref[...]                       # (N, N) compute dtype
    s_bias = sgu_bias_ref[...].reshape(N, 1)   # lane-dense row -> per-token column
    for bi in range(BT):                       # BT is small & static
        mix_scr[bi * N:(bi + 1) * N, :] = (
            jnp.dot(w_s, gate[bi * N:(bi + 1) * N, :],
                    preferred_element_type=jnp.float32) + s_bias)

    v = (mix_scr[...] * res).astype(cdt)       # SGU act is Identity
    x_acc[...] = x + (jnp.dot(v, w_out_ref[...],
                              preferred_element_type=jnp.float32) + b_out)

    # --- finalize: head (LN -> mean pool -> classifier), only at last layer ----
    @pl.when(l == nl - 1)
    def _head():
        g = glob_ref[...]
        lnf_g = g[1:2, :dim]
        lnf_b = g[2:3, :dim]
        b_cls = g[3:4, :ncls_pad]

        def body(wbuf):
            pltpu.sync_copy(w_cls_hbm, wbuf)
            xf = _layernorm(x_acc[...], lnf_g, lnf_b)           # (BT*N, dim)
            pooled = jnp.mean(xf.reshape(BT, N, dim), axis=1)   # (BT, dim)
            out_ref[...] = (jnp.dot(pooled.astype(cdt), wbuf[...],
                                    preferred_element_type=jnp.float32) + b_cls)

        pl.run_scoped(body, pltpu.VMEM((dim, ncls_pad), cdt))


# ----------------------------------------------------------------------------
# Parameters
# ----------------------------------------------------------------------------
def init_params(key, *, in_channel, patch_size, dim, depth, ff_mult,
                num_patches, n_classes):
    half = (dim * ff_mult) // 2
    P = in_channel * patch_size * patch_size
    N = num_patches
    lw = 2 * half                                # per-layer slab width
    ncls_pad = ((n_classes + 127) // 128) * 128  # lane-dense classifier output
    gw = max(dim, ncls_pad)                      # global slab width
    ks = jax.random.split(key, 9)

    def dense(k, shape, scale=0.02):
        return (scale * jax.random.normal(k, shape)).astype(jnp.float32)

    # global slab rows: 0=b_pe, 1=lnf_gamma, 2=lnf_beta, 3=b_cls
    glob = jnp.zeros((8, gw), jnp.float32)
    glob = glob.at[0, :dim].set(dense(ks[0], (dim,), 0.01))
    glob = glob.at[1, :dim].set(1.0)
    glob = glob.at[3, :n_classes].set(dense(ks[1], (n_classes,), 0.01))

    # per-layer slab rows: 0=ln1_g, 1=ln1_b, 2=b_in, 3=sgu_g, 4=sgu_b, 5=b_out
    lslab = jnp.zeros((depth, 8, lw), jnp.float32)
    lslab = lslab.at[:, 0, :dim].set(1.0)
    lslab = lslab.at[:, 2, :].set(dense(ks[2], (depth, lw), 0.01))
    lslab = lslab.at[:, 3, :half].set(1.0)
    lslab = lslab.at[:, 5, :dim].set(dense(ks[3], (depth, dim), 0.01))

    w_cls = jnp.zeros((dim, ncls_pad), jnp.float32)
    w_cls = w_cls.at[:, :n_classes].set(dense(ks[4], (dim, n_classes)))

    return {
        "w_pe": dense(ks[5], (P, dim)),
        # fused proj_in weight: [:, :half] -> res, [:, half:] -> gate
        "w_in": dense(ks[6], (depth, dim, lw)),
        # SGU init: uniform(-1e-3/N, 1e-3/N), bias = ones (as in the reference)
        "sgu_w": ((1e-3 / N) * jax.random.uniform(
            ks[7], (depth, N, N), minval=-1.0, maxval=1.0)).astype(jnp.float32),
        # lane-dense per-token bias (depth, 1, N)
        "sgu_bias": jnp.ones((depth, 1, N), jnp.float32),
        "w_out": dense(ks[8], (depth, half, dim)),
        "w_cls": w_cls,
        "glob": glob,
        "lslab": lslab,
    }


def _to_patches(x_nchw, patch_size):
    B, C, H, W = x_nchw.shape
    ps = patch_size
    h, w = H // ps, W // ps
    # 'b c (h p1) (w p2) -> b (h w) (c p1 p2)'
    p = x_nchw.reshape(B, C, h, ps, w, ps)
    p = p.transpose(0, 2, 4, 1, 3, 5)
    return p.reshape(B, h * w, C * ps * ps)


def _pick_batch_tile(B, N):
    """Weight-reuse roofline: per-layer weights are re-streamed once per batch
    block, so aim for ~2K rows (BT*N) per block; keep >=2 parallel grid steps
    when possible (v7x dual-TC).  BT must be a multiple of 8 or the full batch
    (output BlockSpec (8,128)/full-dim rule)."""
    target_rows = 2048
    cands = sorted(d for d in range(1, B + 1)
                   if B % d == 0 and (d % 8 == 0 or d == B))
    for d in cands:
        if d * N >= target_rows and B // d >= 2:
            return d
    for d in cands:
        if d * N >= target_rows:
            return d
    return cands[-1]


def _vmem_limit_bytes(BT, N, P, dim, half, ncls_pad, wbytes, gw, lw):
    """Generation-aware VMEM budget (double-buffered layer weights, residual and
    SGU scratch, JIT staging buffers, compute intermediates), with headroom."""
    per_layer = ((dim * 2 * half + N * N + half * dim) * wbytes
                 + (8 * lw + 8 * 128) * 4)                 # weights + slab + bias
    scratch = (BT * N * dim + BT * N * half) * 4           # residual + SGU mix
    staging = max(BT * N * P * wbytes + P * dim * wbytes,  # patch-embed staging
                  dim * ncls_pad * wbytes)                  # vs head staging
    interm = 4 * BT * N * (2 * half) * 4                   # u / res / gate / v (f32)
    fixed = 2 * (8 * gw + BT * ncls_pad) * 4
    est = 2 * per_layer + scratch + staging + interm + fixed
    est = int(1.5 * est) + (8 << 20)                        # compiler temporaries
    try:
        cap = int(getattr(pltpu.get_tpu_info(), "vmem_capacity_bytes"))
    except Exception:
        cap = 64 << 20                                      # conservative (v7x)
    cap = int(cap * 0.8)                                    # headroom
    return max(min(est, cap), 32 << 20)


# ----------------------------------------------------------------------------
# Wrapper
# ----------------------------------------------------------------------------
def gmlp_vision_forward(x_nchw, params, *, patch_size, depth, n_classes,
                        batch_tile=None, compute_dtype=jnp.float32):
    dim = params["w_pe"].shape[1]
    half = params["w_out"].shape[1]
    lw = params["lslab"].shape[2]
    gw = params["glob"].shape[1]
    ncls_pad = params["w_cls"].shape[1]

    patches = _to_patches(x_nchw.astype(jnp.float32), patch_size)
    B, N, P = patches.shape

    BT = _pick_batch_tile(B, N) if batch_tile is None else batch_tile
    assert B % BT == 0 and (BT % 8 == 0 or BT == B), (
        "batch_tile must divide batch and be a multiple of 8 (or the full batch)")

    wdt = compute_dtype
    wbytes = jnp.dtype(wdt).itemsize
    # Stream patches at compute precision (bf16 path halves the biggest DMA).
    patches_flat = patches.reshape(B * N, P).astype(wdt)

    args = (
        patches_flat,
        params["w_pe"].astype(wdt),
        params["glob"],                      # f32 small-vector slab (global)
        params["w_in"].astype(wdt),
        params["lslab"],                     # f32 small-vector slab (per layer)
        params["sgu_w"].astype(wdt),
        params["sgu_bias"],                  # f32, lane-dense (depth, 1, N)
        params["w_out"].astype(wdt),
        params["w_cls"].astype(wdt),
    )

    in_specs = [
        pl.BlockSpec(memory_space=pl.ANY),                        # patches (HBM)
        pl.BlockSpec(memory_space=pl.ANY),                        # w_pe    (HBM)
        pl.BlockSpec((8, gw), lambda b, l: (0, 0)),               # global slab
        pl.BlockSpec((None, dim, lw), lambda b, l: (l, 0, 0)),    # w_in (fused)
        pl.BlockSpec((None, 8, lw), lambda b, l: (l, 0, 0)),      # layer slab
        pl.BlockSpec((None, N, N), lambda b, l: (l, 0, 0)),       # sgu_w
        pl.BlockSpec((None, 1, N), lambda b, l: (l, 0, 0)),       # sgu_bias
        pl.BlockSpec((None, half, dim), lambda b, l: (l, 0, 0)),  # w_out
        pl.BlockSpec(memory_space=pl.ANY),                        # w_cls (HBM)
    ]
    out_spec = pl.BlockSpec((BT, ncls_pad), lambda b, l: (b, 0))

    kernel = functools.partial(
        gmlp_kernel, BT=BT, N=N, P=P, dim=dim, half=half,
        ncls_pad=ncls_pad, compute_dtype=wdt)

    fn = pl.pallas_call(
        kernel,
        out_shape=jax.ShapeDtypeStruct((B, ncls_pad), jnp.float32),
        grid_spec=pltpu.PrefetchScalarGridSpec(
            num_scalar_prefetch=0,
            grid=(B // BT, depth),
            in_specs=in_specs,
            out_specs=out_spec,
            scratch_shapes=[pltpu.VMEM((BT * N, dim), jnp.float32),   # residual
                            pltpu.VMEM((BT * N, half), jnp.float32)]),  # SGU mix
        compiler_params=pltpu.CompilerParams(
            dimension_semantics=("parallel", "arbitrary"),
            vmem_limit_bytes=_vmem_limit_bytes(
                BT, N, P, dim, half, ncls_pad, wbytes, gw, lw)),
    )
    out = fn(*args)
    return out[:, :n_classes]                 # drop lane padding


# ----------------------------------------------------------------------------
# Plain-JAX reference (correctness oracle, same packed params)
# ----------------------------------------------------------------------------
def reference_forward(x_nchw, params, *, patch_size, depth, n_classes):
    p = params
    dim = p["w_pe"].shape[1]
    half = p["w_out"].shape[1]
    ncls_pad = p["w_cls"].shape[1]

    x = _to_patches(x_nchw.astype(jnp.float32), patch_size)
    x = x @ p["w_pe"] + p["glob"][0:1, :dim]
    for l in range(depth):
        slab = p["lslab"][l]
        y = _layernorm(x, slab[0:1, :dim], slab[1:2, :dim])
        u = _gelu(y @ p["w_in"][l] + slab[2:3, :])
        res, gate = u[..., :half], u[..., half:]
        gate = _layernorm(gate, slab[3:4, :half], slab[4:5, :half])
        gate = (jnp.einsum("mn,bnd->bmd", p["sgu_w"][l], gate)
                + p["sgu_bias"][l].reshape(1, -1, 1))
        x = x + (gate * res) @ p["w_out"][l] + slab[5:6, :dim]
    x = _layernorm(x, p["glob"][1:2, :dim], p["glob"][2:3, :dim])
    pooled = jnp.mean(x, axis=1)
    logits = pooled @ p["w_cls"] + p["glob"][3:4, :ncls_pad]
    return logits[:, :n_classes]


if __name__ == "__main__":
    # small, consistent hyperparameters
    B, C, H = 2, 4, 16          # batch, in_channel, input_size (square image)
    patch_size = 4
    dim, depth, ff_mult = 32, 2, 4
    n_classes = 10
    num_patches = (H // patch_size) ** 2  # 16

    key = jax.random.PRNGKey(0)
    k_x, k_p = jax.random.split(key)
    x = jax.random.normal(k_x, (B, C, H, H), dtype=jnp.float32)
    params = init_params(k_p, in_channel=C, patch_size=patch_size, dim=dim,
                         depth=depth, ff_mult=ff_mult,
                         num_patches=num_patches, n_classes=n_classes)

    ref = reference_forward(x, params, patch_size=patch_size, depth=depth,
                            n_classes=n_classes)

    # f32 path
    logits = gmlp_vision_forward(x, params, patch_size=patch_size, depth=depth,
                                 n_classes=n_classes)
    logits = jax.block_until_ready(logits)
    assert logits.shape == (B, n_classes)
    assert jnp.allclose(logits, ref, atol=2e-3, rtol=2e-3), (
        f"max abs err {jnp.max(jnp.abs(logits - ref))}")

    # bf16 weight / matmul-operand path (v6e/v7x recommendation); accumulation,
    # LayerNorm, GELU and the residual stream stay in f32 inside the kernel.
    logits_bf16 = gmlp_vision_forward(x, params, patch_size=patch_size,
                                      depth=depth, n_classes=n_classes,
                                      compute_dtype=jnp.bfloat16)
    logits_bf16 = jax.block_until_ready(logits_bf16)
    assert logits_bf16.shape == (B, n_classes)
    assert jnp.allclose(logits_bf16, ref, atol=5e-2, rtol=5e-2), (
        f"bf16 max abs err {jnp.max(jnp.abs(logits_bf16 - ref))}")

    print("KERNEL_OK")
</pallas_src>

<mosaic_0001>
module attributes {stable_mosaic.version = 11 : i64} {
  func.func @gmlp_kernel(%arg0: i32, %arg1: i32, %arg2: memref<32x64xf32, #tpu.memory_space<any>>, %arg3: memref<64x32xf32, #tpu.memory_space<any>>, %arg4: memref<8x128xf32, #tpu.memory_space<vmem>>, %arg5: memref<1x32x128xf32, #tpu.memory_space<vmem>>, %arg6: memref<1x8x128xf32, #tpu.memory_space<vmem>>, %arg7: memref<1x16x16xf32, #tpu.memory_space<vmem>>, %arg8: memref<1x1x16xf32, #tpu.memory_space<vmem>>, %arg9: memref<1x64x32xf32, #tpu.memory_space<vmem>>, %arg10: memref<32x128xf32, #tpu.memory_space<any>>, %arg11: memref<2x128xf32, #tpu.memory_space<vmem>>, %arg12: memref<32x32xf32, #tpu.memory_space<vmem>>, %arg13: memref<32x64xf32, #tpu.memory_space<vmem>>) attributes {dimension_semantics = [#tpu.dimension_semantics<parallel>, #tpu.dimension_semantics<arbitrary>], iteration_bounds = array<i64: 1, 2>, scalar_prefetch = 0 : i64, scratch_operands = 2 : i64, tpu.core_type = #tpu.core_type<tc>, window_params = [{}, {}, {pipeline_mode = #tpu.pipeline_mode<synchronous>, transform_indices = @transform_2, window_bounds = array<i64: 8, 128>}, {transform_indices = @transform_3, window_bounds = array<i64: 1, 32, 128>}, {transform_indices = @transform_4, window_bounds = array<i64: 1, 8, 128>}, {transform_indices = @transform_5, window_bounds = array<i64: 1, 16, 16>}, {transform_indices = @transform_6, window_bounds = array<i64: 1, 1, 16>}, {transform_indices = @transform_7, window_bounds = array<i64: 1, 64, 32>}, {}, {transform_indices = @transform_9, window_bounds = array<i64: 2, 128>}]} {
    %c0_i32 = arith.constant 0 : i32
    %0 = arith.cmpi eq, %arg1, %c0_i32 : i32
    %1 = arith.extui %0 : i1 to i32
    %c0_i32_0 = arith.constant 0 : i32
    %2 = arith.cmpi ne, %1, %c0_i32_0 : i32
    scf.if %2 {
      %c0_42 = arith.constant 0 : index
      %c0_43 = arith.constant 0 : index
      %103 = vector.load %arg4[%c0_42, %c0_43] : memref<8x128xf32, #tpu.memory_space<vmem>>, vector<8x128xf32>
      %104 = vector.extract_strided_slice %103 {offsets = [0, 0], sizes = [1, 32], strides = [1, 1]} : vector<8x128xf32> to vector<1x32xf32>
      "tpu.region"() ({
        %alloca = memref.alloca() : memref<32x64xf32, #tpu.memory_space<vmem>>
        %alloca_44 = memref.alloca() : memref<64x32xf32, #tpu.memory_space<vmem>>
        %c32_i32 = arith.constant 32 : i32
        %105 = arith.muli %arg0, %c32_i32 : i32
        "tpu.region"() ({
          %112 = tpu.sem_alloc : memref<!tpu.dma_semaphore, #tpu.memory_space<semaphore_mem>>
          %c0_i32_52 = arith.constant 0 : i32
          %113 = tpu.memref_slice %arg2[%105, %c0_i32_52] : memref<32x64xf32, #tpu.memory_space<any>> -> memref<32x64xf32, #tpu.memory_space<any>>
          tpu.enqueue_dma source(%113 : memref<32x64xf32, #tpu.memory_space<any>>) target(%alloca : memref<32x64xf32, #tpu.memory_space<vmem>>) target_semaphore(%112 : memref<!tpu.dma_semaphore, #tpu.memory_space<semaphore_mem>>)
          %c0_i32_53 = arith.constant 0 : i32
          %114 = tpu.memref_slice %arg2[%105, %c0_i32_53] : memref<32x64xf32, #tpu.memory_space<any>> -> memref<32x64xf32, #tpu.memory_space<any>>
          tpu.wait_dma2 semaphore(%112 : memref<!tpu.dma_semaphore, #tpu.memory_space<semaphore_mem>>) src(%114 : memref<32x64xf32, #tpu.memory_space<any>>) dst(%alloca : memref<32x64xf32, #tpu.memory_space<vmem>>)
          tpu.yield
        }) : () -> ()
        "tpu.region"() ({
          %112 = tpu.sem_alloc : memref<!tpu.dma_semaphore, #tpu.memory_space<semaphore_mem>>
          tpu.enqueue_dma source(%arg3 : memref<64x32xf32, #tpu.memory_space<any>>) target(%alloca_44 : memref<64x32xf32, #tpu.memory_space<vmem>>) target_semaphore(%112 : memref<!tpu.dma_semaphore, #tpu.memory_space<semaphore_mem>>)
          tpu.wait_dma2 semaphore(%112 : memref<!tpu.dma_semaphore, #tpu.memory_space<semaphore_mem>>) src(%arg3 : memref<64x32xf32, #tpu.memory_space<any>>) dst(%alloca_44 : memref<64x32xf32, #tpu.memory_space<vmem>>)
          tpu.yield
        }) : () -> ()
        %c0_45 = arith.constant 0 : index
        %c0_46 = arith.constant 0 : index
        %106 = vector.load %alloca[%c0_45, %c0_46] : memref<32x64xf32, #tpu.memory_space<vmem>>, vector<32x64xf32>
        %c0_47 = arith.constant 0 : index
        %c0_48 = arith.constant 0 : index
        %107 = vector.load %alloca_44[%c0_47, %c0_48] : memref<64x32xf32, #tpu.memory_space<vmem>>, vector<64x32xf32>
        %cst_49 = arith.constant dense<0.000000e+00> : vector<32x32xf32>
        %108 = tpu.matmul %106, %107, %cst_49 {dimension_numbers = #tpu.dot_dimension_numbers<[1], [0], [0], [1], [0, 0, 1, 1], [], []>} : vector<32x64xf32>, vector<64x32xf32>, vector<32x32xf32> -> vector<32x32xf32>
        %109 = vector.broadcast %104 : vector<1x32xf32> to vector<32x32xf32>
        %110 = arith.addf %108, %109 : vector<32x32xf32>
        %c0_50 = arith.constant 0 : index
        %c0_51 = arith.constant 0 : index
        %111 = vector.load %arg12[%c0_50, %c0_51] : memref<32x32xf32, #tpu.memory_space<vmem>>, vector<32x32xf32>
        tpu.vector_store %arg12[%c0_50, %c0_51], %110 {strides = array<i32>} : memref<32x32xf32, #tpu.memory_space<vmem>>, vector<32x32xf32>,
        tpu.yield
      }) : () -> ()
    } else {
    }
    %c0 = arith.constant 0 : index
    %c0_1 = arith.constant 0 : index
    %c0_2 = arith.constant 0 : index
    %3 = vector.load %arg6[%c0, %c0_1, %c0_2] : memref<1x8x128xf32, #tpu.memory_space<vmem>>, vector<1x8x128xf32>
    %4 = vector.shape_cast %3 : vector<1x8x128xf32> to vector<8x128xf32>
    %5 = vector.extract_strided_slice %4 {offsets = [0, 0], sizes = [1, 32], strides = [1, 1]} : vector<8x128xf32> to vector<1x32xf32>
    %6 = vector.extract_strided_slice %4 {offsets = [1, 0], sizes = [1, 32], strides = [1, 1]} : vector<8x128xf32> to vector<1x32xf32>
    %7 = vector.extract_strided_slice %4 {offsets = [2, 0], sizes = [1, 128], strides = [1, 1]} : vector<8x128xf32> to vector<1x128xf32>
    %8 = vector.extract_strided_slice %4 {offsets = [3, 0], sizes = [1, 64], strides = [1, 1]} : vector<8x128xf32> to vector<1x64xf32>
    %9 = vector.extract_strided_slice %4 {offsets = [4, 0], sizes = [1, 64], strides = [1, 1]} : vector<8x128xf32> to vector<1x64xf32>
    %10 = vector.extract_strided_slice %4 {offsets = [5, 0], sizes = [1, 32], strides = [1, 1]} : vector<8x128xf32> to vector<1x32xf32>
    %c0_3 = arith.constant 0 : index
    %c0_4 = arith.constant 0 : index
    %11 = vector.load %arg12[%c0_3, %c0_4] : memref<32x32xf32, #tpu.memory_space<vmem>>, vector<32x32xf32>
    %cst = arith.constant dense<0.000000e+00> : vector<32xf32>
    %12 = vector.multi_reduction <add>, %11, %cst [1] : vector<32x32xf32> to vector<32xf32>
    %13 = vector.shape_cast %12 : vector<32xf32> to vector<32x1xf32>
    %cst_5 = arith.constant 3.200000e+01 : f32
    %14 = vector.broadcast %cst_5 : f32 to vector<32x1xf32>
    %15 = arith.divf %13, %14 : vector<32x1xf32>
    %16 = vector.broadcast %15 : vector<32x1xf32> to vector<32x32xf32>
    %17 = arith.subf %11, %16 : vector<32x32xf32>
    %18 = arith.mulf %17, %17 : vector<32x32xf32>
    %cst_6 = arith.constant dense<0.000000e+00> : vector<32xf32>
    %19 = vector.multi_reduction <add>, %18, %cst_6 [1] : vector<32x32xf32> to vector<32xf32>
    %20 = vector.shape_cast %19 : vector<32xf32> to vector<32x1xf32>
    %cst_7 = arith.constant 3.200000e+01 : f32
    %21 = vector.broadcast %cst_7 : f32 to vector<32x1xf32>
    %22 = arith.divf %20, %21 : vector<32x1xf32>
    %23 = vector.broadcast %15 : vector<32x1xf32> to vector<32x32xf32>
    %24 = arith.subf %11, %23 : vector<32x32xf32>
    %cst_8 = arith.constant 9.99999974E-6 : f32
    %25 = vector.broadcast %cst_8 : f32 to vector<32x1xf32>
    %26 = arith.addf %22, %25 : vector<32x1xf32>
    %27 = math.rsqrt %26 : vector<32x1xf32>
    %28 = vector.broadcast %27 : vector<32x1xf32> to vector<32x32xf32>
    %29 = arith.mulf %24, %28 : vector<32x32xf32>
    %30 = vector.broadcast %5 : vector<1x32xf32> to vector<32x32xf32>
    %31 = arith.mulf %29, %30 : vector<32x32xf32>
    %32 = vector.broadcast %6 : vector<1x32xf32> to vector<32x32xf32>
    %33 = arith.addf %31, %32 : vector<32x32xf32>
    %c0_9 = arith.constant 0 : index
    %c0_10 = arith.constant 0 : index
    %c0_11 = arith.constant 0 : index
    %34 = vector.load %arg5[%c0_9, %c0_10, %c0_11] : memref<1x32x128xf32, #tpu.memory_space<vmem>>, vector<1x32x128xf32>
    %35 = vector.shape_cast %34 : vector<1x32x128xf32> to vector<32x128xf32>
    %cst_12 = arith.constant dense<0.000000e+00> : vector<32x128xf32>
    %36 = tpu.matmul %33, %35, %cst_12 {dimension_numbers = #tpu.dot_dimension_numbers<[1], [0], [0], [1], [0, 0, 1, 1], [], []>} : vector<32x32xf32>, vector<32x128xf32>, vector<32x128xf32> -> vector<32x128xf32>
    %37 = vector.broadcast %7 : vector<1x128xf32> to vector<32x128xf32>
    %38 = arith.addf %36, %37 : vector<32x128xf32>
    %cst_13 = arith.constant 5.000000e-01 : f32
    %39 = vector.broadcast %cst_13 : f32 to vector<32x128xf32>
    %40 = arith.mulf %39, %38 : vector<32x128xf32>
    %cst_14 = arith.constant 4.471500e-02 : f32
    %41 = vector.broadcast %cst_14 : f32 to vector<32x128xf32>
    %42 = arith.mulf %41, %38 : vector<32x128xf32>
    %43 = arith.mulf %42, %38 : vector<32x128xf32>
    %44 = arith.mulf %43, %38 : vector<32x128xf32>
    %45 = arith.addf %38, %44 : vector<32x128xf32>
    %cst_15 = arith.constant 0.797884583 : f32
    %46 = vector.broadcast %cst_15 : f32 to vector<32x128xf32>
    %47 = arith.mulf %46, %45 : vector<32x128xf32>
    %48 = math.tanh %47 : vector<32x128xf32>
    %cst_16 = arith.constant 1.000000e+00 : f32
    %49 = vector.broadcast %cst_16 : f32 to vector<32x128xf32>
    %50 = arith.addf %49, %48 : vector<32x128xf32>
    %51 = arith.mulf %40, %50 : vector<32x128xf32>
    %52 = vector.extract_strided_slice %51 {offsets = [0, 0], sizes = [32, 64], strides = [1, 1]} : vector<32x128xf32> to vector<32x64xf32>
    %53 = vector.extract_strided_slice %51 {offsets = [0, 64], sizes = [32, 64], strides = [1, 1]} : vector<32x128xf32> to vector<32x64xf32>
    %cst_17 = arith.constant dense<0.000000e+00> : vector<32xf32>
    %54 = vector.multi_reduction <add>, %53, %cst_17 [1] : vector<32x64xf32> to vector<32xf32>
    %55 = vector.shape_cast %54 : vector<32xf32> to vector<32x1xf32>
    %cst_18 = arith.constant 6.400000e+01 : f32
    %56 = vector.broadcast %cst_18 : f32 to vector<32x1xf32>
    %57 = arith.divf %55, %56 : vector<32x1xf32>
    %58 = vector.broadcast %57 : vector<32x1xf32> to vector<32x64xf32>
    %59 = arith.subf %53, %58 : vector<32x64xf32>
    %60 = arith.mulf %59, %59 : vector<32x64xf32>
    %cst_19 = arith.constant dense<0.000000e+00> : vector<32xf32>
    %61 = vector.multi_reduction <add>, %60, %cst_19 [1] : vector<32x64xf32> to vector<32xf32>
    %62 = vector.shape_cast %61 : vector<32xf32> to vector<32x1xf32>
    %cst_20 = arith.constant 6.400000e+01 : f32
    %63 = vector.broadcast %cst_20 : f32 to vector<32x1xf32>
    %64 = arith.divf %62, %63 : vector<32x1xf32>
    %65 = vector.broadcast %57 : vector<32x1xf32> to vector<32x64xf32>
    %66 = arith.subf %53, %65 : vector<32x64xf32>
    %cst_21 = arith.constant 9.99999974E-6 : f32
    %67 = vector.broadcast %cst_21 : f32 to vector<32x1xf32>
    %68 = arith.addf %64, %67 : vector<32x1xf32>
    %69 = math.rsqrt %68 : vector<32x1xf32>
    %70 = vector.broadcast %69 : vector<32x1xf32> to vector<32x64xf32>
    %71 = arith.mulf %66, %70 : vector<32x64xf32>
    %72 = vector.broadcast %8 : vector<1x64xf32> to vector<32x64xf32>
    %73 = arith.mulf %71, %72 : vector<32x64xf32>
    %74 = vector.broadcast %9 : vector<1x64xf32> to vector<32x64xf32>
    %75 = arith.addf %73, %74 : vector<32x64xf32>
    %c0_22 = arith.constant 0 : index
    %c0_23 = arith.constant 0 : index
    %c0_24 = arith.constant 0 : index
    %76 = vector.load %arg7[%c0_22, %c0_23, %c0_24] : memref<1x16x16xf32, #tpu.memory_space<vmem>>, vector<1x16x16xf32>
    %77 = vector.shape_cast %76 : vector<1x16x16xf32> to vector<16x16xf32>
    %c0_25 = arith.constant 0 : index
    %c0_26 = arith.constant 0 : index
    %c0_27 = arith.constant 0 : index
    %78 = vector.load %arg8[%c0_25, %c0_26, %c0_27] : memref<1x1x16xf32, #tpu.memory_space<vmem>>, vector<1x1x16xf32>
    %79 = vector.shape_cast %78 : vector<1x1x16xf32> to vector<1x16xf32>
    %80 = vector.shape_cast %79 : vector<1x16xf32> to vector<16x1xf32>
    %81 = vector.extract_strided_slice %75 {offsets = [0, 0], sizes = [16, 64], strides = [1, 1]} : vector<32x64xf32> to vector<16x64xf32>
    %cst_28 = arith.constant dense<0.000000e+00> : vector<16x64xf32>
    %82 = tpu.matmul %77, %81, %cst_28 {dimension_numbers = #tpu.dot_dimension_numbers<[1], [0], [0], [1], [0, 0, 1, 1], [], []>} : vector<16x16xf32>, vector<16x64xf32>, vector<16x64xf32> -> vector<16x64xf32>
    %83 = vector.broadcast %80 : vector<16x1xf32> to vector<16x64xf32>
    %84 = arith.addf %82, %83 : vector<16x64xf32>
    %c0_29 = arith.constant 0 : index
    %c0_30 = arith.constant 0 : index
    %85 = vector.load %arg13[%c0_29, %c0_30] : memref<32x64xf32, #tpu.memory_space<vmem>>, vector<16x64xf32>
    tpu.vector_store %arg13[%c0_29, %c0_30], %84 {strides = array<i32>} : memref<32x64xf32, #tpu.memory_space<vmem>>, vector<16x64xf32>,
    %86 = vector.extract_strided_slice %75 {offsets = [16, 0], sizes = [16, 64], strides = [1, 1]} : vector<32x64xf32> to vector<16x64xf32>
    %cst_31 = arith.constant dense<0.000000e+00> : vector<16x64xf32>
    %87 = tpu.matmul %77, %86, %cst_31 {dimension_numbers = #tpu.dot_dimension_numbers<[1], [0], [0], [1], [0, 0, 1, 1], [], []>} : vector<16x16xf32>, vector<16x64xf32>, vector<16x64xf32> -> vector<16x64xf32>
    %88 = vector.broadcast %80 : vector<16x1xf32> to vector<16x64xf32>
    %89 = arith.addf %87, %88 : vector<16x64xf32>
    %c16 = arith.constant 16 : index
    %c0_32 = arith.constant 0 : index
    %90 = vector.load %arg13[%c16, %c0_32] : memref<32x64xf32, #tpu.memory_space<vmem>>, vector<16x64xf32>
    tpu.vector_store %arg13[%c16, %c0_32], %89 {strides = array<i32>} : memref<32x64xf32, #tpu.memory_space<vmem>>, vector<16x64xf32>,
    %c0_33 = arith.constant 0 : index
    %c0_34 = arith.constant 0 : index
    %91 = vector.load %arg13[%c0_33, %c0_34] : memref<32x64xf32, #tpu.memory_space<vmem>>, vector<32x64xf32>
    %92 = arith.mulf %91, %52 : vector<32x64xf32>
    %c0_35 = arith.constant 0 : index
    %c0_36 = arith.constant 0 : index
    %c0_37 = arith.constant 0 : index
    %93 = vector.load %arg9[%c0_35, %c0_36, %c0_37] : memref<1x64x32xf32, #tpu.memory_space<vmem>>, vector<1x64x32xf32>
    %94 = vector.shape_cast %93 : vector<1x64x32xf32> to vector<64x32xf32>
    %cst_38 = arith.constant dense<0.000000e+00> : vector<32x32xf32>
    %95 = tpu.matmul %92, %94, %cst_38 {dimension_numbers = #tpu.dot_dimension_numbers<[1], [0], [0], [1], [0, 0, 1, 1], [], []>} : vector<32x64xf32>, vector<64x32xf32>, vector<32x32xf32> -> vector<32x32xf32>
    %96 = vector.broadcast %10 : vector<1x32xf32> to vector<32x32xf32>
    %97 = arith.addf %95, %96 : vector<32x32xf32>
    %98 = arith.addf %11, %97 : vector<32x32xf32>
    %c0_39 = arith.constant 0 : index
    %c0_40 = arith.constant 0 : index
    %99 = vector.load %arg12[%c0_39, %c0_40] : memref<32x32xf32, #tpu.memory_space<vmem>>, vector<32x32xf32>
    tpu.vector_store %arg12[%c0_39, %c0_40], %98 {strides = array<i32>} : memref<32x32xf32, #tpu.memory_space<vmem>>, vector<32x32xf32>,
    %c1_i32 = arith.constant 1 : i32
    %100 = arith.cmpi eq, %arg1, %c1_i32 : i32
    %101 = arith.extui %100 : i1 to i32
    %c0_i32_41 = arith.constant 0 : i32
    %102 = arith.cmpi ne, %101, %c0_i32_41 : i32
    scf.if %102 {
      %c0_42 = arith.constant 0 : index
      %c0_43 = arith.constant 0 : index
      %103 = vector.load %arg4[%c0_42, %c0_43] : memref<8x128xf32, #tpu.memory_space<vmem>>, vector<8x128xf32>
      %104 = vector.extract_strided_slice %103 {offsets = [1, 0], sizes = [1, 32], strides = [1, 1]} : vector<8x128xf32> to vector<1x32xf32>
      %105 = vector.extract_strided_slice %103 {offsets = [2, 0], sizes = [1, 32], strides = [1, 1]} : vector<8x128xf32> to vector<1x32xf32>
      %106 = vector.extract_strided_slice %103 {offsets = [3, 0], sizes = [1, 128], strides = [1, 1]} : vector<8x128xf32> to vector<1x128xf32>
      "tpu.region"() ({
        %alloca = memref.alloca() : memref<32x128xf32, #tpu.memory_space<vmem>>
        "tpu.region"() ({
          %139 = tpu.sem_alloc : memref<!tpu.dma_semaphore, #tpu.memory_space<semaphore_mem>>
          tpu.enqueue_dma source(%arg10 : memref<32x128xf32, #tpu.memory_space<any>>) target(%alloca : memref<32x128xf32, #tpu.memory_space<vmem>>) target_semaphore(%139 : memref<!tpu.dma_semaphore, #tpu.memory_space<semaphore_mem>>)
          tpu.wait_dma2 semaphore(%139 : memref<!tpu.dma_semaphore, #tpu.memory_space<semaphore_mem>>) src(%arg10 : memref<32x128xf32, #tpu.memory_space<any>>) dst(%alloca : memref<32x128xf32, #tpu.memory_space<vmem>>)
          tpu.yield
        }) : () -> ()
        %c0_44 = arith.constant 0 : index
        %c0_45 = arith.constant 0 : index
        %107 = vector.load %arg12[%c0_44, %c0_45] : memref<32x32xf32, #tpu.memory_space<vmem>>, vector<32x32xf32>
        %cst_46 = arith.constant dense<0.000000e+00> : vector<32xf32>
        %108 = vector.multi_reduction <add>, %107, %cst_46 [1] : vector<32x32xf32> to vector<32xf32>
        %109 = vector.shape_cast %108 : vector<32xf32> to vector<32x1xf32>
        %cst_47 = arith.constant 3.200000e+01 : f32
        %110 = vector.broadcast %cst_47 : f32 to vector<32x1xf32>
        %111 = arith.divf %109, %110 : vector<32x1xf32>
        %112 = vector.broadcast %111 : vector<32x1xf32> to vector<32x32xf32>
        %113 = arith.subf %107, %112 : vector<32x32xf32>
        %114 = arith.mulf %113, %113 : vector<32x32xf32>
        %cst_48 = arith.constant dense<0.000000e+00> : vector<32xf32>
        %115 = vector.multi_reduction <add>, %114, %cst_48 [1] : vector<32x32xf32> to vector<32xf32>
        %116 = vector.shape_cast %115 : vector<32xf32> to vector<32x1xf32>
        %cst_49 = arith.constant 3.200000e+01 : f32
        %117 = vector.broadcast %cst_49 : f32 to vector<32x1xf32>
        %118 = arith.divf %116, %117 : vector<32x1xf32>
        %119 = vector.broadcast %111 : vector<32x1xf32> to vector<32x32xf32>
        %120 = arith.subf %107, %119 : vector<32x32xf32>
        %cst_50 = arith.constant 9.99999974E-6 : f32
        %121 = vector.broadcast %cst_50 : f32 to vector<32x1xf32>
        %122 = arith.addf %118, %121 : vector<32x1xf32>
        %123 = math.rsqrt %122 : vector<32x1xf32>
        %124 = vector.broadcast %123 : vector<32x1xf32> to vector<32x32xf32>
        %125 = arith.mulf %120, %124 : vector<32x32xf32>
        %126 = vector.broadcast %104 : vector<1x32xf32> to vector<32x32xf32>
        %127 = arith.mulf %125, %126 : vector<32x32xf32>
        %128 = vector.broadcast %105 : vector<1x32xf32> to vector<32x32xf32>
        %129 = arith.addf %127, %128 : vector<32x32xf32>
        %130 = vector.shape_cast %129 : vector<32x32xf32> to vector<2x16x32xf32>
        %cst_51 = arith.constant dense<0.000000e+00> : vector<2x32xf32>
        %131 = vector.multi_reduction <add>, %130, %cst_51 [1] : vector<2x16x32xf32> to vector<2x32xf32>
        %cst_52 = arith.constant 1.600000e+01 : f32
        %132 = vector.broadcast %cst_52 : f32 to vector<2x32xf32>
        %133 = arith.divf %131, %132 : vector<2x32xf32>
        %c0_53 = arith.constant 0 : index
        %c0_54 = arith.constant 0 : index
        %134 = vector.load %alloca[%c0_53, %c0_54] : memref<32x128xf32, #tpu.memory_space<vmem>>, vector<32x128xf32>
        %cst_55 = arith.constant dense<0.000000e+00> : vector<2x128xf32>
        %135 = tpu.matmul %133, %134, %cst_55 {dimension_numbers = #tpu.dot_dimension_numbers<[1], [0], [0], [1], [0, 0, 1, 1], [], []>} : vector<2x32xf32>, vector<32x128xf32>, vector<2x128xf32> -> vector<2x128xf32>
        %136 = vector.broadcast %106 : vector<1x128xf32> to vector<2x128xf32>
        %137 = arith.addf %135, %136 : vector<2x128xf32>
        %c0_56 = arith.constant 0 : index
        %c0_57 = arith.constant 0 : index
        %138 = vector.load %arg11[%c0_56, %c0_57] : memref<2x128xf32, #tpu.memory_space<vmem>>, vector<2x128xf32>
        tpu.vector_store %arg11[%c0_56, %c0_57], %137 {strides = array<i32>} : memref<2x128xf32, #tpu.memory_space<vmem>>, vector<2x128xf32>,
        tpu.yield
      }) : () -> ()
    } else {
    }
    return
  }
  func.func @transform_2(%arg0: i32, %arg1: i32) -> (i32, i32) {
    %c0_i32 = arith.constant 0 : i32
    %c0_i32_0 = arith.constant 0 : i32
    %c0_i32_1 = arith.constant 0 : i32
    return %c0_i32, %c0_i32_0 : i32, i32
  }
  func.func @transform_3(%arg0: i32, %arg1: i32) -> (i32, i32, i32) {
    %c0_i32 = arith.constant 0 : i32
    %c0_i32_0 = arith.constant 0 : i32
    %c0_i32_1 = arith.constant 0 : i32
    return %arg1, %c0_i32, %c0_i32_0 : i32, i32, i32
  }
  func.func @transform_4(%arg0: i32, %arg1: i32) -> (i32, i32, i32) {
    %c0_i32 = arith.constant 0 : i32
    %c0_i32_0 = arith.constant 0 : i32
    %c0_i32_1 = arith.constant 0 : i32
    return %arg1, %c0_i32, %c0_i32_0 : i32, i32, i32
  }
  func.func @transform_5(%arg0: i32, %arg1: i32) -> (i32, i32, i32) {
    %c0_i32 = arith.constant 0 : i32
    %c0_i32_0 = arith.constant 0 : i32
    %c0_i32_1 = arith.constant 0 : i32
    return %arg1, %c0_i32, %c0_i32_0 : i32, i32, i32
  }
  func.func @transform_6(%arg0: i32, %arg1: i32) -> (i32, i32, i32) {
    %c0_i32 = arith.constant 0 : i32
    %c0_i32_0 = arith.constant 0 : i32
    %c0_i32_1 = arith.constant 0 : i32
    return %arg1, %c0_i32, %c0_i32_0 : i32, i32, i32
  }
  func.func @transform_7(%arg0: i32, %arg1: i32) -> (i32, i32, i32) {
    %c0_i32 = arith.constant 0 : i32
    %c0_i32_0 = arith.constant 0 : i32
    %c0_i32_1 = arith.constant 0 : i32
    return %arg1, %c0_i32, %c0_i32_0 : i32, i32, i32
  }
  func.func @transform_9(%arg0: i32, %arg1: i32) -> (i32, i32) {
    %c0_i32 = arith.constant 0 : i32
    %c0_i32_0 = arith.constant 0 : i32
    return %arg0, %c0_i32 : i32, i32
  }
}

</mosaic_0001>

<bundles_post_ra>
// kernel: tpu_custom_call.1
= control target key start
LH: loop header
LB: loop body
LE: loop exit
PB: predicated region body
PF: predicated region fallthrough
CT: control target
= control target key end

     0   :  { %14 = vsyncpa [#allocation5], 0  ;;  %s1991_s30 = smov 0   ;;  %s1993_s10 = smov 0   ;;  %s2295_s0 = inlined_call_operand.vmem [shape: f32[32,64], index: 0, kind: input, shape index: {}]   ;;  %s2296_s1 = inlined_call_operand.vmem [shape: f32[64,32], index: 1, kind: input, shape index: {}]   ;;  %s2297_s2 = inlined_call_operand.vmem [shape: f32[8,128], index: 2, kind: input, shape index: {}]   ;;  %s2298_s3 = inlined_call_operand.vmem [shape: f32[2,32,128], index: 3, kind: input, shape index: {}]   ;;  %s2299_s4 = inlined_call_operand.vmem [shape: f32[2,8,128], index: 4, kind: input, shape index: {}]   ;;  %s2300_s5 = inlined_call_operand.vmem [shape: f32[2,16,16], index: 5, kind: input, shape index: {}]   ;;  %s2301_s6 = inlined_call_operand.vmem [shape: f32[2,1,16], index: 6, kind: input, shape index: {}]   ;;  %s2302_s7 = inlined_call_operand.vmem [shape: f32[2,64,32], index: 7, kind: input, shape index: {}]   ;;  %s2303_s8 = inlined_call_operand.vmem [shape: f32[32,128], index: 8, kind: input, shape index: {}]   ;;  %s2304_s9 = inlined_call_operand.hbm [shape: f32[2,128], index: 9, kind: output, shape index: {}]  }
   0x1   :  { %s1995_s11 = smov 0  }
   0x2 LB: > { %s29_s13 = sadd.s32 1, %s1930_s10  ;;  %p1574_p1 = scmp.ge.s32.totalorder %s1934_s11, 1  ;;  %s1934_s11 = sphi %s1995_s11, %s20_s11   ;;  %s1930_s10 = sphi %s1993_s10, %s2310_s10   ;;  %s1926_s30 = sphi %s1991_s30, %s2309_s30  }
   0x3   : > { %p30_p0 = scmp.ge.s32.totalorder %s29_s13, 2  ;;  %p265_p2 = scmp.lt.s32.totalorder %s1934_s11, 3 }
   0x5   : > { %s2312_s13 = smov (%p30_p0, %s29_s13), 0  ;;  %p266_p3 = pnand %p1574_p1, %p265_p2 }
   0x6   : > { %2305 = sst [smem:[#allocation19_spill]] %s2312_s13  ;;  %p307_p4 = scmp.lt.s32.totalorder (!%p266_p3), %s1926_s30, 1 }
   0x7   : > { %269 = sbr.rel (%p266_p3) target bundleno = 2538 (0x9ea), region = 44  ;;  %p1582_p5 = scmp.ne.s32.totalorder (!%p266_p3), %s1926_s30, 0 }
   0xe   : > { %s2014_s14 = scalar_select %p307_p4, %s1926_s30, 1 }
   0xf   : > { %332 = sbr.rel (%p1582_p5) target bundleno = 266 (0x10a), region = 48  ;;  %v333_v0 = vld [vmem:[%s2297_s2] sm:$0xff] (!%p1582_p5) }
  0x10   : > { %s1606_s15 = sshll.u32 %s2014_s14, 5  ;;  %s1577_s16 = sshll.u32 %s2014_s14, 3 }
  0x11   : > { %s2021_s19 = scalar_lea.vmem %s2298_s3, %s1606_s15  ;;  %s2026_s22 = scalar_lea.vmem %s2299_s4, %s1577_s16 }
  0x12   : > { %s1607_s23 = sshll.u32 %s2014_s14, 4  ;;  %s323_s26 = scalar_lea.vmem %s2301_s6, %s2014_s14 }
  0x13   : > { %s2036_s29 = scalar_lea.vmem %s2300_s5, %s1607_s23  ;;  %s1608_s12 = sshll.u32 %s2014_s14, 6 }
  0x14   : > { %s2042_s15 = scalar_lea.vmem %s2302_s7, %s1608_s12 }
  0x16   : > { %v368_v1 = vld [vmem:[%s2295_s0] sm:$0xff]  ;;  %v370_v2 = vld [vmem:[%s2295_s0 + $0x8] sm:$0xff]  ;;  %v372_v3 = vld [vmem:[%s2295_s0 + $0x10] sm:$0xff] }
  0x17   : > { %v374_v4 = vld [vmem:[%s2295_s0 + $0x18] sm:$0xff] }
  0x18   : > { %383 = vsyncadd [#allocation8], 512 }
  0x19   : > { %1914 = dma.done.wait [#allocation8], 512 }
  0x1a   : > { %1915 = vsyncadd [#allocation8], 4294966784 }
  0x1b   : > { %v419_v5 = vld [vmem:[%s2296_s1] sm:$0xff]  ;;  %v421_v6 = vld [vmem:[%s2296_s1 + $0x8] sm:$0xff]  ;;  %v423_v7 = vld [vmem:[%s2296_s1 + $0x10] sm:$0xff] }
  0x1c   : > { %v425_v8 = vld [vmem:[%s2296_s1 + $0x18] sm:$0xff]  ;;  %v427_v9 = vld [vmem:[%s2296_s1 + $0x20] sm:$0xff]  ;;  %v429_v10 = vld [vmem:[%s2296_s1 + $0x28] sm:$0xff] }
  0x1d   : > { %v431_v11 = vld [vmem:[%s2296_s1 + $0x30] sm:$0xff]  ;;  %v433_v12 = vld [vmem:[%s2296_s1 + $0x38] sm:$0xff] }
  0x1e   : > { %442 = vsyncadd [#allocation10], 1024 }
  0x1f   : > { %1916 = dma.done.wait [#allocation10], 1024 }
  0x20   : > { %1917 = vsyncadd [#allocation10], 4294966272  ;;  %v1737_v13 = vpack.c.bf16 %v421_v6, %v419_v5  ;;  %v1741_v14 = vpack.c.bf16 %v425_v8, %v423_v7  ;;  %vm462_vm0 = vcmask 523264   ;;  %v1745_v15 = vpack.c.bf16 %v429_v10, %v427_v9 }
  0x21   : > { %1670 = vmatprep.mubr.msk.f32.mxu0 %vm462_vm0, %v368_v1  ;;  %1673 = vmatprep.mubr.msk.f32.mxu1 %vm462_vm0, %v372_v3  ;;  %v1749_v16 = vpack.c.bf16 %v433_v12, %v431_v11  ;;  %v458_v17 = vlaneseq  ;;  %vm560_vm1 = vcmask 261120  }
  0x22   : > { %1738 = vmatprep.subr.bf16.mxu0 %v1737_v13  ;;  %1791 = vmatprep.subr.bf16.mxu1 %v1737_v13 }
  0x23   : > { %1740 = vmatpush3.bf16.msra.mxu0 %v1737_v13  ;;  %1795 = vmatpush3.bf16.msra.mxu1 %v1737_v13  ;;  %v459_v18 = vshrl.u32 %v458_v17, 7 }
  0x24   : > { %1742 = vmatprep.subr.bf16.mxu0 %v1741_v14  ;;  %1792 = vmatprep.subr.bf16.mxu1 %v1741_v14 }
  0x25   : > { %v460_v19 = vsub.s32 0, %v459_v18 }
  0x27   : > { %1744 = vmatpush3.bf16.msra.mxu0 %v1741_v14  ;;  %1796 = vmatpush3.bf16.msra.mxu1 %v1741_v14  ;;  %v461_v20 = vrot.slane %v333_v0, %v460_v19 }
  0x28   : > { %1746 = vmatprep.subr.bf16.mxu0 %v1745_v15  ;;  %1793 = vmatprep.subr.bf16.mxu1 %v1745_v15 }
  0x2b   : > { %1748 = vmatpush3.bf16.msra.mxu0 %v1745_v15  ;;  %1797 = vmatpush3.bf16.msra.mxu1 %v1745_v15 }
  0x2c   : > { %1750 = vmatprep.subr.bf16.mxu0 %v1749_v16  ;;  %1794 = vmatprep.subr.bf16.mxu1 %v1749_v16 }
  0x2f   : > { %1752 = vmatpush3.bf16.msra.mxu0 %v1749_v16  ;;  %1798 = vmatpush3.bf16.msra.mxu1 %v1749_v16 }
  0x32   : > { %1671 = vmatmul.mubr.msk.f32.vlgmr.msra.gmra.mrb[0].mxu0 %vm462_vm0, %v370_v2  ;;  %1674 = vmatmul.mubr.msk.f32.vlgmr.msra.gmra.mrb[0].mxu1 %vm462_vm0, %v374_v4 }
 0x105   : > { %v1672_v21 = vpop.f32.mrb[0].mxu0  ;;  %v1675_v22 = vpop.f32.mrb[0].mxu1 }
 0x106   : > { %v547_v23 = vadd.f32 %v1672_v21, %v461_v20  ;;  %v557_v24 = vadd.f32 %v1675_v22, %v461_v20  ;;  %v541_v25 = vpop.f32.mrb[1].mxu0  ;;  %v551_v26 = vpop.f32.mrb[1].mxu1 }
 0x107   : > { %v542_v27 = vadd.f32 %v541_v25, %v461_v20  ;;  %v552_v28 = vadd.f32 %v551_v26, %v461_v20 }
 0x108   : > { %562 = vst.msk [vmem:[#allocation2 + $0x8] sm:$0xff] %vm560_vm1, %v547_v23  ;;  %564 = vst.msk [vmem:[#allocation2 + $0x18] sm:$0xff] %vm560_vm1, %v557_v24 }
 0x109   : > { %561 = vst.msk [vmem:[#allocation2] sm:$0xff] %vm560_vm1, %v542_v27  ;;  %563 = vst.msk [vmem:[#allocation2 + $0x10] sm:$0xff] %vm560_vm1, %v552_v28 }
 0x10a PF: > { %vm570_vm2 = vcmask 261120   ;;  %v640_v57 = vld [vmem:[%s2021_s19] sm:$0xff]  ;;  %v641_v58 = vld [vmem:[%s2021_s19 + $0x8] sm:$0xff]  ;;  %v642_v59 = vld [vmem:[%s2021_s19 + $0x10] sm:$0xff]  ;;  %v624_v1 = vlaneseq  ;;  %vm797_vm3 = vcmask 523264   ;;  %vm913_vm4 = vcmask 130048  }
 0x10b   : > { %v1753_v60 = vpack.c.bf16 %v641_v58, %v640_v57  ;;  %v643_v61 = vld [vmem:[%s2021_s19 + $0x18] sm:$0xff]  ;;  %v2120_v14 = vld [vmem:[%s2026_s22] sm:$0xff]  ;;  %s1936_s19 = smov 64   ;;  %p1600_p6 = scmp.ne.s32.totalorder %s1926_s30, 1 }
 0x10c   : > { %v1757_v62 = vpack.c.bf16 %v643_v61, %v642_v59  ;;  %v2116_v7 = vshrl.u32 %v624_v1, 7 }
 0x10d   : > { %1754 = vmatprep.subr.bf16.mxu1 %v1753_v60 }
 0x10e   : > { %1756 = vmatpush3.bf16.msra.mxu1 %v1753_v60  ;;  %v626_v12 = vsub.s32 0, %v2116_v7  ;;  %v634_v15 = vsub.s32 1, %v2116_v7 }
 0x10f   : > { %v2092_v31 = vld [vmem:[#allocation2 + $0x8] sm:$0xff]  ;;  %v2098_v34 = vld [vmem:[#allocation2 + $0x18] sm:$0xff]  ;;  %1758 = vmatprep.subr.bf16.mxu1 %v1757_v62 }
 0x110   : > { %v2088_v29 = vld [vmem:[#allocation2] sm:$0xff]  ;;  %v2090_v30 = vld [vmem:[#allocation2 + $0x10] sm:$0xff]  ;;  %v574_v35 = vsel %vm570_vm2, %v2092_v31, 0.0  ;;  %v580_v36 = vsel %vm570_vm2, %v2098_v34, 0.0  ;;  %v627_v16 = vrot.slane %v2120_v14, %v626_v12  ;;  %v635_v19 = vrot.slane %v2120_v14, %v634_v15 }
 0x111   : > { %v571_v32 = vsel %vm570_vm2, %v2088_v29, 0.0  ;;  %v577_v33 = vsel %vm570_vm2, %v2090_v30, 0.0 }
 0x112   : > { %572 = vadd.xlane.f32.xlu0 %v571_v32  ;;  %578 = vadd.xlane.f32.xlu1 %v577_v33 }
 0x113   : > { %1760 = vmatpush3.bf16.msra.mxu1 %v1757_v62 }
 0x116   : > { %575 = vadd.xlane.f32.xlu0 %v574_v35  ;;  %581 = vadd.xlane.f32.xlu1 %v580_v36 }
 0x19f   : > { %v573_v37 = vpop.xlane.xlu0 %572  ;;  %v579_v38 = vpop.xlane.xlu1 %578 }
 0x1a0   : > { %v584_v39 = vmul.f32 0.03125, %v573_v37  ;;  %v586_v40 = vmul.f32 0.03125, %v579_v38  ;;  %v646_v38 = vsub.s32 2, %v2116_v7 }
 0x1a2   : > { %v588_v41 = vsub.f32 %v2088_v29, %v584_v39  ;;  %v590_v42 = vsub.f32 %v2090_v30, %v586_v40  ;;  %v647_v39 = vrot.slane %v2120_v14, %v646_v38 }
 0x1a3   : > { %v576_v43 = vpop.xlane.xlu0 %575  ;;  %v582_v44 = vpop.xlane.xlu1 %581 }
 0x1a4   : > { %v585_v45 = vmul.f32 0.03125, %v576_v43  ;;  %v587_v46 = vmul.f32 0.03125, %v582_v44  ;;  %v592_v47 = vmul.f32 %v588_v41, %v588_v41  ;;  %v594_v48 = vmul.f32 %v590_v42, %v590_v42 }
 0x1a6   : > { %v589_v49 = vsub.f32 %v2092_v31, %v585_v45  ;;  %v591_v50 = vsub.f32 %v2098_v34, %v587_v46  ;;  %v596_v51 = vsel %vm570_vm2, %v592_v47, 0.0  ;;  %v602_v52 = vsel %vm570_vm2, %v594_v48, 0.0 }
 0x1a7   : > { %597 = vadd.xlane.f32.xlu0 %v596_v51 }
 0x1a8   : > { %v593_v53 = vmul.f32 %v589_v49, %v589_v49  ;;  %v595_v54 = vmul.f32 %v591_v50, %v591_v50 }
 0x1aa   : > { %v599_v55 = vsel %vm570_vm2, %v593_v53, 0.0  ;;  %v605_v56 = vsel %vm570_vm2, %v595_v54, 0.0 }
 0x1ab   : > { %603 = vadd.xlane.f32.xlu0 %v602_v52  ;;  %600 = vadd.xlane.f32.xlu1 %v599_v55 }
 0x1af   : > { %606 = vadd.xlane.f32.xlu1 %v605_v56 }
 0x234   : > { %v598_v63 = vpop.xlane.xlu0 %597 }
 0x235   : > { %v608_v0 = vmul.f32 0.03125, %v598_v63 }
 0x237   : > { %v612_v2 = vadd.f32 1e-05, %v608_v0 }
 0x238   : > { %v601_v3 = vpop.xlane.xlu1 %600  ;;  %v604_v4 = vpop.xlane.xlu0 %603 }
 0x239   : > { %1844 = vrsqrt.f32 %v612_v2  ;;  %v609_v5 = vmul.f32 0.03125, %v601_v3  ;;  %v610_v6 = vmul.f32 0.03125, %v604_v4 }
 0x23b   : > { %v613_v8 = vadd.f32 1e-05, %v609_v5  ;;  %v614_v9 = vadd.f32 1e-05, %v610_v6 }
 0x23c   : > { %v607_v10 = vpop.xlane.xlu1 %606 }
 0x23d   : > { %1846 = vrsqrt.f32 %v613_v8  ;;  %v611_v11 = vmul.f32 0.03125, %v607_v10 }
 0x23e   : > { %1848 = vrsqrt.f32 %v614_v9 }
 0x23f   : > { %v615_v13 = vadd.f32 1e-05, %v611_v11 }
 0x241   : > { %1850 = vrsqrt.f32 %v615_v13 }
 0x243   : > { %v1845_v17 = vpop.eup %1844 }
 0x244   : > { %v620_v18 = vmul.f32 %v1845_v17, %v588_v41 }
 0x246   : > { %v628_v20 = vmul.f32 %v627_v16, %v620_v18 }
 0x247   : > { %v1847_v21 = vpop.eup %1846 }
 0x248   : > { %v1849_v22 = vpop.eup %1848  ;;  %v636_v23 = vadd.f32 %v635_v19, %v628_v20  ;;  %v621_v24 = vmul.f32 %v1847_v21, %v589_v49 }
 0x249   : > { %v622_v25 = vmul.f32 %v1849_v22, %v590_v42 }
 0x24a   : > { %1684 = vmatprep.mubr.msk.f32.mxu1 %vm570_vm2, %v636_v23  ;;  %v629_v26 = vmul.f32 %v627_v16, %v621_v24 }
 0x24b   : > { %v1851_v27 = vpop.eup %1850  ;;  %v630_v28 = vmul.f32 %v627_v16, %v622_v25 }
 0x24c   : > { %v637_v32 = vadd.f32 %v635_v19, %v629_v26  ;;  %v623_v33 = vmul.f32 %v1851_v27, %v591_v50 }
 0x24d   : > { %v638_v35 = vadd.f32 %v635_v19, %v630_v28 }
 0x24e   : > { %1685 = vmatmul.mubr.msk.f32.vlgmr.msra.gmra.mrb[0].mxu1 %vm570_vm2, %v637_v32  ;;  %v631_v36 = vmul.f32 %v627_v16, %v623_v33 }
 0x24f   : > { %1687 = vmatprep.mubr.msk.f32.mxu1 %vm570_vm2, %v638_v35 }
 0x250   : > { %v639_v37 = vadd.f32 %v635_v19, %v631_v36 }
 0x252   : > { %1688 = vmatmul.mubr.msk.f32.gmra.mrb[2].mxu1 %vm570_vm2, %v639_v37 }
 0x321   : > { %v1686_v40 = vpop.f32.mrb[0].mxu1 }
 0x322   : > { %v732_v41 = vadd.f32 %v1686_v40, %v647_v39  ;;  %v726_v42 = vpop.f32.mrb[1].mxu1 }
 0x323   : > { %v727_v43 = vadd.f32 %v726_v42, %v647_v39 }
 0x324   : > { %v750_v44 = vmul.f32 0.044715, %v732_v41  ;;  %v746_v6 = vmul.f32 0.5, %v732_v41 }
 0x325   : > { %v749_v45 = vmul.f32 0.044715, %v727_v43  ;;  %v1689_v46 = vpop.f32.mrb[2].mxu1  ;;  %v745_v9 = vmul.f32 0.5, %v727_v43 }
 0x326   : > { %v754_v47 = vmul.f32 %v750_v44, %v732_v41  ;;  %v742_v48 = vadd.f32 %v1689_v46, %v647_v39  ;;  %v736_v49 = vpop.f32.mrb[3].mxu1 }
 0x327   : > { %v753_v50 = vmul.f32 %v749_v45, %v727_v43  ;;  %v737_v51 = vadd.f32 %v736_v49, %v647_v39 }
 0x328   : > { %v752_v52 = vmul.f32 0.044715, %v742_v48  ;;  %v758_v53 = vmul.f32 %v754_v47, %v732_v41  ;;  %v748_v21 = vmul.f32 0.5, %v742_v48 }
 0x329   : > { %v751_v54 = vmul.f32 0.044715, %v737_v51  ;;  %v757_v55 = vmul.f32 %v753_v50, %v727_v43  ;;  %v747_v17 = vmul.f32 0.5, %v737_v51 }
 0x32a   : > { %v756_v56 = vmul.f32 %v752_v52, %v742_v48  ;;  %v762_v57 = vadd.f32 %v758_v53, %v732_v41 }
 0x32b   : > { %v755_v58 = vmul.f32 %v751_v54, %v737_v51  ;;  %v761_v59 = vadd.f32 %v757_v55, %v727_v43 }
 0x32c   : > { %v766_v60 = vmul.f32 0.7978846, %v762_v57  ;;  %v760_v61 = vmul.f32 %v756_v56, %v742_v48 }
 0x32d   : > { %v765_v62 = vmul.f32 0.7978846, %v761_v59  ;;  %v759_v63 = vmul.f32 %v755_v58, %v737_v51  ;;  %v881_v59 = vsub.s32 4, %v2116_v7 }
 0x32e   : > { %1852 = vtanh.f32 %v766_v60  ;;  %v764_v0 = vadd.f32 %v760_v61, %v742_v48 }
 0x32f   : > { %1854 = vtanh.f32 %v765_v62  ;;  %v763_v1 = vadd.f32 %v759_v63, %v737_v51  ;;  %v882_v61 = vrot.slane %v2120_v14, %v881_v59  ;;  %v869_v62 = vsub.s32 3, %v2116_v7  ;;  %v1093_v59 = vld [vmem:[%s2042_s15 + $0x18] sm:$0xff] }
 0x330   : > { %v768_v2 = vmul.f32 0.7978846, %v764_v0 }
 0x331   : > { %v767_v3 = vmul.f32 0.7978846, %v763_v1  ;;  %v870_v63 = vrot.slane %v2120_v14, %v869_v62 }
 0x332   : > { %1856 = vtanh.f32 %v768_v2 }
 0x333   : > { %1858 = vtanh.f32 %v767_v3 }
 0x338   : > { %v1853_v4 = vpop.eup %1852 }
 0x339   : > { %v1855_v5 = vpop.eup %1854  ;;  %v774_v8 = vadd.f32 1.0, %v1853_v4 }
 0x33a   : > { %v773_v10 = vadd.f32 1.0, %v1855_v5 }
 0x33b   : > { %v2135_v11 = vmul.f32 %v774_v8, %v746_v6 }
 0x33c   : > { %v1857_v12 = vpop.eup %1856  ;;  %v2137_v13 = vmul.f32 %v773_v10, %v745_v9 }
 0x33d   : > { %v1859_v16 = vpop.eup %1858  ;;  %787 = vrot.lane.b32.xlu1 %v2135_v11, %s1936_s19  ;;  %v776_v20 = vadd.f32 1.0, %v1857_v12 }
 0x33e   : > { %785 = vrot.lane.b32.xlu0 %v2137_v13, %s1936_s19  ;;  %v775_v18 = vadd.f32 1.0, %v1859_v16 }
 0x33f   : > { %v2147_v22 = vmul.f32 %v776_v20, %v748_v21 }
 0x340   : > { %v2143_v19 = vmul.f32 %v775_v18, %v747_v17 }
 0x342   : > { %789 = vrot.lane.b32.xlu1 %v2143_v19, %s1936_s19 }
 0x346   : > { %791 = vrot.lane.b32.xlu1 %v2147_v22, %s1936_s19 }
 0x3af   : > { %v788_v23 = vpop.permute.xlu1 %787 }
 0x3b0   : > { %v786_v24 = vpop.permute.xlu0 %785  ;;  %v801_v25 = vsel %vm797_vm3, %v788_v23, 0.0 }
 0x3b1   : > { %802 = vadd.xlane.f32.xlu1 %v801_v25  ;;  %v798_v26 = vsel %vm797_vm3, %v786_v24, 0.0  ;;  %v891_v25 = vld [vmem:[%s2036_s29] sm:$0xff] }
 0x3b2   : > { %799 = vadd.xlane.f32.xlu0 %v798_v26  ;;  %1694 = vmatprep.mubr.msk.f32.mxu1 %vm913_vm4, %v891_v25 }
 0x3b4   : > { %v790_v27 = vpop.permute.xlu1 %789 }
 0x3b5   : > { %v804_v28 = vsel %vm797_vm3, %v790_v27, 0.0 }
 0x3b6   : > { %805 = vadd.xlane.f32.xlu0 %v804_v28 }
 0x3b8   : > { %v792_v32 = vpop.permute.xlu1 %791 }
 0x3b9   : > { %v807_v33 = vsel %vm797_vm3, %v792_v32, 0.0 }
 0x3ba   : > { %808 = vadd.xlane.f32.xlu0 %v807_v33 }
 0x43e   : > { %v803_v35 = vpop.xlane.xlu1 %802 }
 0x43f   : > { %v812_v36 = vmul.f32 0.015625, %v803_v35  ;;  %v800_v37 = vpop.xlane.xlu0 %799 }
 0x440   : > { %v811_v39 = vmul.f32 0.015625, %v800_v37 }
 0x441   : > { %v816_v40 = vsub.f32 %v2135_v11, %v812_v36 }
 0x442   : > { %v815_v41 = vsub.f32 %v2137_v13, %v811_v39 }
 0x443   : > { %v806_v42 = vpop.xlane.xlu0 %805  ;;  %v820_v43 = vmul.f32 %v816_v40, %v816_v40 }
 0x444   : > { %v813_v44 = vmul.f32 0.015625, %v806_v42  ;;  %v819_v45 = vmul.f32 %v815_v41, %v815_v41  ;;  %v1591_v42 = vld [vmem:[%s323_s26] ss:$0 sm:$0xff] }
 0x445   : > { %829 = vrot.lane.b32.xlu1 %v820_v43, %s1936_s19  ;;  %v1090_v43 = vld [vmem:[%s2042_s15] sm:$0xff] }
 0x446   : > { %v817_v46 = vsub.f32 %v2143_v19, %v813_v44  ;;  %827 = vrot.lane.b32.xlu0 %v819_v45, %s1936_s19  ;;  %v1091_v44 = vld [vmem:[%s2042_s15 + $0x8] sm:$0xff] }
 0x447   : > { %v809_v47 = vpop.xlane.xlu0 %808 }
 0x448   : > { %v814_v48 = vmul.f32 0.015625, %v809_v47  ;;  %v821_v49 = vmul.f32 %v817_v46, %v817_v46 }
 0x44a   : > { %v818_v50 = vsub.f32 %v2147_v22, %v814_v48  ;;  %831 = vrot.lane.b32.xlu1 %v821_v49, %s1936_s19  ;;  %v1769_v48 = vpack.c.bf16 %v1091_v44, %v1090_v43 }
 0x44c   : > { %v822_v51 = vmul.f32 %v818_v50, %v818_v50  ;;  %1770 = vmatprep.subr.bf16.mxu0 %v1769_v48 }
 0x44d   : > { %1772 = vmatpush3.bf16.msra.mxu0 %v1769_v48 }
 0x44e   : > { %833 = vrot.lane.b32.xlu1 %v822_v51, %s1936_s19 }
 0x4b7   : > { %v830_v52 = vpop.permute.xlu1 %829 }
 0x4b8   : > { %v828_v53 = vpop.permute.xlu0 %827  ;;  %v842_v54 = vsel %vm797_vm3, %v830_v52, 0.0 }
 0x4b9   : > { %843 = vadd.xlane.f32.xlu1 %v842_v54  ;;  %v839_v55 = vsel %vm797_vm3, %v828_v53, 0.0  ;;  %v892_v53 = vld [vmem:[%s2036_s29 + $0x8] sm:$0xff] }
 0x4ba   : > { %840 = vadd.xlane.f32.xlu0 %v839_v55 }
 0x4bc   : > { %v832_v56 = vpop.permute.xlu1 %831 }
 0x4bd   : > { %v845_v60 = vsel %vm797_vm3, %v832_v56, 0.0 }
 0x4c0   : > { %v834_v57 = vpop.permute.xlu1 %833 }
 0x4c1   : > { %v848_v58 = vsel %vm797_vm3, %v834_v57, 0.0 }
 0x4c2   : > { %849 = vadd.xlane.f32.xlu0 %v848_v58  ;;  %v1092_v58 = vld [vmem:[%s2042_s15 + $0x10] sm:$0xff] }
 0x4c6   : > { %846 = vadd.xlane.f32.xlu0 %v845_v60  ;;  %v1773_v60 = vpack.c.bf16 %v1093_v59, %v1092_v58 }
 0x4c8   : > { %1774 = vmatprep.subr.bf16.mxu0 %v1773_v60 }
 0x4c9   : > { %1776 = vmatpush3.bf16.msra.mxu0 %v1773_v60 }
 0x4ca   : > { %884 = vrot.lane.b32.xlu1 %v882_v61, %s1936_s19  ;;  %v1094_v61 = vld [vmem:[%s2042_s15 + $0x20] sm:$0xff] }
 0x4dc   : > { %872 = vrot.lane.b32.xlu0 %v870_v63, %s1936_s19  ;;  %v1095_v63 = vld [vmem:[%s2042_s15 + $0x28] sm:$0xff] }
 0x4e0   : > { %899 = vbcast.lane.b32.xlu0 %v1591_v42, 256 }
 0x546   : > { %v844_v0 = vpop.xlane.xlu1 %843 }
 0x547   : > { %v852_v1 = vmul.f32 0.015625, %v844_v0  ;;  %v841_v2 = vpop.xlane.xlu0 %840  ;;  %v1096_v0 = vld [vmem:[%s2042_s15 + $0x30] sm:$0xff] }
 0x548   : > { %v851_v3 = vmul.f32 0.015625, %v841_v2  ;;  %v1097_v2 = vld [vmem:[%s2042_s15 + $0x38] sm:$0xff] }
 0x549   : > { %v856_v4 = vadd.f32 1e-05, %v852_v1  ;;  %v1777_v1 = vpack.c.bf16 %v1095_v63, %v1094_v61 }
 0x54a   : > { %v855_v5 = vadd.f32 1e-05, %v851_v3  ;;  %v885_v24 = vpop.permute.xlu1 %884  ;;  %v1781_v3 = vpack.c.bf16 %v1097_v2, %v1096_v0 }
 0x54b   : > { %1860 = vrsqrt.f32 %v856_v4  ;;  %1778 = vmatprep.subr.bf16.mxu0 %v1777_v1 }
 0x54c   : > { %1862 = vrsqrt.f32 %v855_v5  ;;  %1780 = vmatpush3.bf16.msra.mxu0 %v1777_v1 }
 0x54d   : > { %1782 = vmatprep.subr.bf16.mxu0 %v1781_v3 }
 0x54f   : > { %v850_v6 = vpop.xlane.xlu0 %849 }
 0x550   : > { %v854_v8 = vmul.f32 0.015625, %v850_v6  ;;  %1784 = vmatpush3.bf16.msra.mxu0 %v1781_v3 }
 0x552   : > { %v858_v9 = vadd.f32 1e-05, %v854_v8 }
 0x553   : > { %v847_v10 = vpop.xlane.xlu0 %846 }
 0x554   : > { %1864 = vrsqrt.f32 %v858_v9  ;;  %v853_v12 = vmul.f32 0.015625, %v847_v10 }
 0x555   : > { %v1861_v16 = vpop.eup %1860 }
 0x556   : > { %v1863_v17 = vpop.eup %1862  ;;  %v857_v18 = vadd.f32 1e-05, %v853_v12  ;;  %v864_v20 = vmul.f32 %v1861_v16, %v816_v40 }
 0x557   : > { %v863_v21 = vmul.f32 %v1863_v17, %v815_v41  ;;  %v873_v23 = vpop.permute.xlu0 %872 }
 0x558   : > { %1866 = vrsqrt.f32 %v857_v18  ;;  %v876_v26 = vmul.f32 %v873_v23, %v864_v20 }
 0x559   : > { %v875_v27 = vmul.f32 %v873_v23, %v863_v21 }
 0x55a   : > { %v888_v28 = vadd.f32 %v885_v24, %v876_v26 }
 0x55b   : > { %v887_v32 = vadd.f32 %v885_v24, %v875_v27  ;;  %v900_v5 = vpop.permute.xlu0 %899 }
 0x55d   : > { %v1834_v33 = vpack.i.bf16 %v888_v28, %v887_v32 }
 0x55e   : > { %v1865_v35 = vpop.eup %1864 }
 0x55f   : > { %v866_v36 = vmul.f32 %v1865_v35, %v818_v50  ;;  %1835 = vrot.lane.b32.xlu1 %v1834_v33, %s1936_s19 }
 0x561   : > { %v878_v40 = vmul.f32 %v873_v23, %v866_v36 }
 0x562   : > { %v1867_v37 = vpop.eup %1866 }
 0x563   : > { %v865_v39 = vmul.f32 %v1867_v37, %v817_v46  ;;  %v890_v47 = vadd.f32 %v885_v24, %v878_v40 }
 0x565   : > { %v877_v41 = vmul.f32 %v873_v23, %v865_v39 }
 0x567   : > { %v889_v45 = vadd.f32 %v885_v24, %v877_v41 }
 0x569   : > { %v1839_v49 = vpack.i.bf16 %v890_v47, %v889_v45 }
 0x56b   : > { %1840 = vrot.lane.b32.xlu1 %v1839_v49, %s1936_s19 }
 0x56f   : > { %903 = vbcast.lane.b32.xlu1 %v1591_v42, 264 }
 0x5d1   : > { %v1836_v46 = vpop.permute.xlu1 %1835 }
 0x5d2   : > { %v1838_v50 = vunpack.i.h.bf16 %v1836_v46  ;;  %v1837_v51 = vunpack.i.l.bf16 %v1836_v46 }
 0x5d4   : > { %v1761_v52 = vpack.c.bf16 %v1838_v50, %v1837_v51 }
 0x5d6   : > { %1762 = vmatprep.subr.bf16.mxu1 %v1761_v52 }
 0x5d7   : > { %1764 = vmatpush3.bf16.msra.mxu1 %v1761_v52 }
 0x5da   : > { %1695 = vmatmul.mubr.msk.f32.vlgmr.msra.gmra.mrb[4].mxu1 %vm913_vm4, %v892_v53 }
 0x5db   : > { %1701 = vmatprep.mubr.msk.f32.mxu1 %vm913_vm4, %v891_v25 }
 0x5dd   : > { %v1841_v54 = vpop.permute.xlu1 %1840 }
 0x5de   : > { %v1843_v55 = vunpack.i.h.bf16 %v1841_v54  ;;  %v1842_v56 = vunpack.i.l.bf16 %v1841_v54 }
 0x5e0   : > { %v1765_v57 = vpack.c.bf16 %v1843_v55, %v1842_v56 }
 0x5e1   : > { %v904_v4 = vpop.permute.xlu1 %903 }
 0x5e2   : > { %1766 = vmatprep.subr.bf16.mxu1 %v1765_v57 }
 0x5e3   : > { %1768 = vmatpush3.bf16.msra.mxu1 %v1765_v57 }
 0x5e6   : > { %1702 = vmatmul.mubr.msk.f32.vlgmr.msra.gmra.mrb[6].mxu1 %vm913_vm4, %v892_v53 }
 0x6ad   : > { %v1696_v6 = vpop.f32.mrb[4].mxu1 }
 0x6ae   : > { %v992_v8 = vadd.f32 %v1696_v6, %v904_v4  ;;  %v986_v9 = vpop.f32.mrb[5].mxu1 }
 0x6af   : > { %v987_v10 = vadd.f32 %v986_v9, %v900_v5 }
 0x6b0   : > { %996 = vst.msk [vmem:[#allocation3 + $0x8] sm:$0xff] %vm797_vm3, %v992_v8 }
 0x6b1   : > { %995 = vst.msk [vmem:[#allocation3] sm:$0xff] %vm797_vm3, %v987_v10 }
 0x6b7   : > { %v1083_v12 = vld [vmem:[#allocation3 + $0x8] sm:$0xff] }
 0x6b8   : > { %v1082_v16 = vld [vmem:[#allocation3] sm:$0xff]  ;;  %v1087_v23 = vmul.f32 %v1083_v12, %v2135_v11  ;;  %v1100_v11 = vsub.s32 5, %v2116_v7 }
 0x6b9   : > { %v1703_v17 = vpop.f32.mrb[6].mxu1  ;;  %v1086_v18 = vmul.f32 %v1082_v16, %v2137_v13 }
 0x6ba   : > { %v1077_v20 = vadd.f32 %v1703_v17, %v904_v4  ;;  %v1071_v21 = vpop.f32.mrb[7].mxu1  ;;  %v1101_v13 = vrot.slane %v2120_v14, %v1100_v11 }
 0x6bb   : > { %v1072_v24 = vadd.f32 %v1071_v21, %v900_v5  ;;  %1720 = vmatprep.mubr.msk.f32.mxu0 %vm797_vm3, %v1086_v18 }
 0x6bc   : > { %1081 = vst.msk [vmem:[#allocation3 + $0x18] sm:$0xff] %vm797_vm3, %v1077_v20  ;;  %1721 = vmatmul.mubr.msk.f32.vlgmr.msra.gmra.mrb[0].mxu0 %vm797_vm3, %v1087_v23 }
 0x6bd   : > { %1080 = vst.msk [vmem:[#allocation3 + $0x10] sm:$0xff] %vm797_vm3, %v1072_v24 }
 0x6c3   : > { %v1085_v25 = vld [vmem:[#allocation3 + $0x18] sm:$0xff] }
 0x6c4   : > { %v1084_v26 = vld [vmem:[#allocation3 + $0x10] sm:$0xff]  ;;  %v1089_v28 = vmul.f32 %v1085_v25, %v2147_v22 }
 0x6c5   : > { %v1088_v27 = vmul.f32 %v1084_v26, %v2143_v19 }
 0x6c7   : > { %1723 = vmatprep.mubr.msk.f32.mxu0 %vm797_vm3, %v1088_v27 }
 0x6c8   : > { %1724 = vmatmul.mubr.msk.f32.gmra.mrb[2].mxu0 %vm797_vm3, %v1089_v28 }
 0x78f   : > { %v1722_v32 = vpop.f32.mrb[0].mxu0 }
 0x790   : > { %v1186_v33 = vadd.f32 %v1722_v32, %v1101_v13  ;;  %v1180_v35 = vpop.f32.mrb[1].mxu0 }
 0x791   : > { %v1181_v36 = vadd.f32 %v1180_v35, %v1101_v13 }
 0x792   : > { %v1200_v37 = vadd.f32 %v1186_v33, %v2092_v31 }
 0x793   : > { %v1199_v39 = vadd.f32 %v1181_v36, %v2088_v29  ;;  %v2222_v29 = vld [vmem:[%s2297_s2] sm:$0xff] (!%p1600_p6) }
 0x794   : > { %1204 = vst.msk [vmem:[#allocation2 + $0x8] sm:$0xff] %vm570_vm2, %v1200_v37 }
 0x795   : > { %1203 = vst.msk [vmem:[#allocation2] sm:$0xff] %vm570_vm2, %v1199_v39 }
 0x79b   : > { %v1725_v19 = vpop.f32.mrb[2].mxu0  ;;  %1210 = sbr.rel (%p1600_p6) target bundleno = 2513 (0x9d1), region = 123 }
 0x79c   : > { %v1196_v22 = vadd.f32 %v1725_v19, %v1101_v13  ;;  %v1190_v40 = vpop.f32.mrb[3].mxu0 }
 0x79d   : > { %v1191_v41 = vadd.f32 %v1190_v40, %v1101_v13 }
 0x79e   : > { %v1202_v42 = vadd.f32 %v1196_v22, %v2098_v34 }
 0x79f   : > { %v1201_v14 = vadd.f32 %v1191_v41, %v2090_v30 }
 0x7a0   : > { %1206 = vst.msk [vmem:[#allocation2 + $0x18] sm:$0xff] %vm570_vm2, %v1202_v42 }
 0x7a1   : > { %1205 = vst.msk [vmem:[#allocation2 + $0x10] sm:$0xff] %vm570_vm2, %v1201_v14 }
 0x7a2   : > { %v1244_v31 = vld [vmem:[%s2303_s8] sm:$0xff]  ;;  %v1246_v30 = vld [vmem:[%s2303_s8 + $0x8] sm:$0xff]  ;;  %v1248_v34 = vld [vmem:[%s2303_s8 + $0x10] sm:$0xff] }
 0x7a3   : > { %v1250_v43 = vld [vmem:[%s2303_s8 + $0x18] sm:$0xff] }
 0x7a4   : > { %1259 = vsyncadd [#allocation13], 512 }
 0x7a5   : > { %1918 = dma.done.wait [#allocation13], 512 }
 0x7a6   : > { %1919 = vsyncadd [#allocation13], 4294966784  ;;  %v1263_v44 = vld [vmem:[#allocation2] sm:$0xff]  ;;  %v1264_v47 = vld [vmem:[#allocation2 + $0x8] sm:$0xff]  ;;  %v1786_v10 = vpack.c.bf16 %v1246_v30, %v1244_v31  ;;  %v1937_v12 = vmov 0.0|0.0   ;;  %v1789_v16 = vpack.c.bf16 %v1250_v43, %v1248_v34  ;;  %vm1938_vm5 = vmmov 0  }
 0x7a7   : > { %v1267_v48 = vsel %vm570_vm2, %v1263_v44, 0.0  ;;  %v1266_v46 = vld [vmem:[#allocation2 + $0x18] sm:$0xff]  ;;  %v1270_v50 = vsel %vm570_vm2, %v1264_v47, 0.0  ;;  %1785 = vmatprep.subr.bf16.mxu0 %v1937_v12  ;;  %v1939_v17 = vmov 0.0   ;;  %v1322_v33 = vrot.slane %v2222_v29, %v634_v15 }
 0x7a8   : > { %v1265_v45 = vld [vmem:[#allocation2 + $0x10] sm:$0xff]  ;;  %1268 = vadd.xlane.f32.xlu0 %v1267_v48  ;;  %v1276_v51 = vsel %vm570_vm2, %v1266_v46, 0.0  ;;  %1787 = vmatpush3.bf16.msra.mxu0 %v1786_v10  ;;  %v1330_v39 = vrot.slane %v2222_v29, %v646_v38  ;;  %vm1366_vm6 = vcmask 1041409  }
 0x7a9   : > { %v1273_v49 = vsel %vm570_vm2, %v1265_v45, 0.0  ;;  %1734 = vmatprep.mubr.msk.f32.mxu0 %vm1938_vm5, %v1939_v17  ;;  %1788 = vmatprep.subr.bf16.mxu0 %v1937_v12 }
 0x7aa   : > { %1274 = vadd.xlane.f32.xlu1 %v1273_v49 }
 0x7ac   : > { %1271 = vadd.xlane.f32.xlu0 %v1270_v50  ;;  %1790 = vmatpush3.bf16.msra.mxu0 %v1789_v16 }
 0x7ae   : > { %1277 = vadd.xlane.f32.xlu1 %v1276_v51 }
 0x835   : > { %v1269_v52 = vpop.xlane.xlu0 %1268 }
 0x836   : > { %v1279_v54 = vmul.f32 0.03125, %v1269_v52 }
 0x837   : > { %v1275_v53 = vpop.xlane.xlu1 %1274 }
 0x838   : > { %v1281_v55 = vmul.f32 0.03125, %v1275_v53  ;;  %v1283_v56 = vsub.f32 %v1263_v44, %v1279_v54 }
 0x839   : > { %v1272_v58 = vpop.xlane.xlu0 %1271 }
 0x83a   : > { %v1285_v57 = vsub.f32 %v1265_v45, %v1281_v55  ;;  %v1280_v60 = vmul.f32 0.03125, %v1272_v58  ;;  %v1287_v63 = vmul.f32 %v1283_v56, %v1283_v56 }
 0x83b   : > { %v1278_v59 = vpop.xlane.xlu1 %1277 }
 0x83c   : > { %v1282_v61 = vmul.f32 0.03125, %v1278_v59  ;;  %v1289_v0 = vmul.f32 %v1285_v57, %v1285_v57  ;;  %v1284_v1 = vsub.f32 %v1264_v47, %v1280_v60  ;;  %v1291_v3 = vsel %vm570_vm2, %v1287_v63, 0.0 }
 0x83d   : > { %1292 = vadd.xlane.f32.xlu0 %v1291_v3  ;;  %v1363_v3 = vrot.slane %v2222_v29, %v869_v62 }
 0x83e   : > { %v1286_v2 = vsub.f32 %v1266_v46, %v1282_v61  ;;  %v1297_v4 = vsel %vm570_vm2, %v1289_v0, 0.0  ;;  %v1288_v5 = vmul.f32 %v1284_v1, %v1284_v1 }
 0x840   : > { %v1290_v6 = vmul.f32 %v1286_v2, %v1286_v2  ;;  %v1294_v8 = vsel %vm570_vm2, %v1288_v5, 0.0 }
 0x841   : > { %1298 = vadd.xlane.f32.xlu0 %v1297_v4  ;;  %1295 = vadd.xlane.f32.xlu1 %v1294_v8 }
 0x842   : > { %v1300_v9 = vsel %vm570_vm2, %v1290_v6, 0.0 }
 0x845   : > { %1301 = vadd.xlane.f32.xlu1 %v1300_v9 }
 0x8ca   : > { %v1293_v18 = vpop.xlane.xlu0 %1292 }
 0x8cb   : > { %v1303_v20 = vmul.f32 0.03125, %v1293_v18 }
 0x8cd   : > { %v1307_v21 = vadd.f32 1e-05, %v1303_v20 }
 0x8ce   : > { %v1296_v23 = vpop.xlane.xlu1 %1295  ;;  %v1299_v24 = vpop.xlane.xlu0 %1298 }
 0x8cf   : > { %1868 = vrsqrt.f32 %v1307_v21  ;;  %v1304_v25 = vmul.f32 0.03125, %v1296_v23  ;;  %v1305_v26 = vmul.f32 0.03125, %v1299_v24 }
 0x8d1   : > { %v1308_v27 = vadd.f32 1e-05, %v1304_v25  ;;  %v1309_v28 = vadd.f32 1e-05, %v1305_v26 }
 0x8d2   : > { %v1302_v11 = vpop.xlane.xlu1 %1301 }
 0x8d3   : > { %1870 = vrsqrt.f32 %v1308_v27  ;;  %v1306_v13 = vmul.f32 0.03125, %v1302_v11 }
 0x8d4   : > { %1872 = vrsqrt.f32 %v1309_v28 }
 0x8d5   : > { %v1310_v32 = vadd.f32 1e-05, %v1306_v13 }
 0x8d7   : > { %1874 = vrsqrt.f32 %v1310_v32 }
 0x8d9   : > { %v1869_v35 = vpop.eup %1868 }
 0x8da   : > { %v1315_v36 = vmul.f32 %v1869_v35, %v1283_v56 }
 0x8dc   : > { %v1323_v37 = vmul.f32 %v1322_v33, %v1315_v36 }
 0x8dd   : > { %v1871_v19 = vpop.eup %1870 }
 0x8de   : > { %v1873_v22 = vpop.eup %1872  ;;  %v1316_v40 = vmul.f32 %v1871_v19, %v1284_v1  ;;  %v1331_v14 = vadd.f32 %v1330_v39, %v1323_v37 }
 0x8df   : > { %v1317_v41 = vmul.f32 %v1873_v22, %v1285_v57 }
 0x8e0   : > { %v1324_v42 = vmul.f32 %v1322_v33, %v1316_v40  ;;  %v1335_v15 = vsel %vm570_vm2, %v1331_v14, 0.0 }
 0x8e1   : > { %v1875_v31 = vpop.eup %1874  ;;  %v1325_v30 = vmul.f32 %v1322_v33, %v1317_v41 }
 0x8e2   : > { %v1318_v34 = vmul.f32 %v1875_v31, %v1286_v2  ;;  %v1332_v43 = vadd.f32 %v1330_v39, %v1324_v42 }
 0x8e3   : > { %v1333_v45 = vadd.f32 %v1330_v39, %v1325_v30 }
 0x8e4   : > { %v1326_v44 = vmul.f32 %v1322_v33, %v1318_v34  ;;  %v1336_v47 = vsel %vm570_vm2, %v1332_v43, 0.0 }
 0x8e5   : > { %v1337_v48 = vadd.f32 %v1336_v47, %v1335_v15  ;;  %v1344_v38 = vsel %vm570_vm2, %v1333_v45, 0.0 }
 0x8e6   : > { %v1334_v49 = vadd.f32 %v1330_v39, %v1326_v44 }
 0x8e7   : > { %v1338_v46 = vrot.slane %v1337_v48, 4 }
 0x8e8   : > { %v1345_v50 = vsel %vm570_vm2, %v1334_v49, 0.0 }
 0x8e9   : > { %v1339_v51 = vadd.f32 %v1338_v46, %v1337_v48  ;;  %v1346_v52 = vadd.f32 %v1345_v50, %v1344_v38 }
 0x8eb   : > { %v1340_v53 = vrot.slane %v1339_v51, 2  ;;  %v1347_v54 = vrot.slane %v1346_v52, 4 }
 0x8ed   : > { %v1341_v55 = vadd.f32 %v1340_v53, %v1339_v51  ;;  %v1348_v56 = vadd.f32 %v1347_v54, %v1346_v52 }
 0x8ef   : > { %v1342_v57 = vrot.slane %v1341_v55, 1  ;;  %v1349_v58 = vrot.slane %v1348_v56, 2 }
 0x8f1   : > { %v1350_v59 = vadd.f32 %v1349_v58, %v1348_v56  ;;  %v1343_v60 = vadd.f32 %v1342_v57, %v1341_v55 }
 0x8f3   : > { %v1351_v61 = vrot.slane %v1350_v59, 1  ;;  %v1354_v0 = vmul.f32 0.0625, %v1343_v60 }
 0x8f5   : > { %v1352_v63 = vadd.f32 %v1351_v61, %v1350_v59 }
 0x8f7   : > { %v1355_v1 = vmul.f32 0.0625, %v1352_v63 }
 0x8f9   : > { %v1367_v2 = vsel %vm1366_vm6, %v1355_v1, %v1354_v0 }
 0x8fa   : > { %1735 = vmatmul.mubr.msk.f32.vlgmr.msra.gmra.mrb[0].mxu0 %vm570_vm2, %v1367_v2 }
 0x9cd   : > { %v1436_v4 = vpop.f32.mrb[0].mxu0 }
 0x9ce   : > { %v1437_v5 = vadd.f32 %v1436_v4, %v1363_v3  ;;  %v1736_v6 = vpop.f32.mrb[1].mxu0 }
 0x9d0   : > { %1440 = vst [vmem:[#allocation4] sm:$0x3] %v1437_v5 }
 0x9d1 PF: > { %s2306_s12 = sadd.s32 4294967295, %s1934_s11   ;;  %s1940_s28 = smov [#allocation4]  }
 0x9d2   : > { %p2260_p7 = scmp.eq.s32.totalorder %s2306_s12, 1  ;;  %s1450_s17 = sshll.u32 %s1940_s28, 4  ;;  %s1451_s17 = int_to_ptr.vmem [resolvable:$true] %s1450_s17 }
 0x9d3   : > { %s1876_s16 = scalar_lea.vmem %s1451_s17, 32  ;;  %p1883_p11 = scmp.lt.s32.totalorder %s1451_s17, %s1451_s17 }
 0x9d4   : > { %p1877_p8 = scmp.ne.s32.totalorder %s1451_s17, %s1876_s16  ;;  %p1884_p12 = scmp.lt.s32.totalorder %s1876_s16, %s1876_s16 }
 0x9d6   : > { %p1878_p9 = pnand %p1877_p8, %p2260_p7  ;;  %p1885_p13 = por %p1884_p12, %p1883_p11 }
 0x9d8   : > { %p1879_p10 = pneg %p1878_p9 }
 0x9da   : > { %p1886_p0 = pnand %p1885_p13, %p1879_p10 }
 0x9dc   : > { %1889 = shalt.err (!%p1886_p0)
}
 0x9dd   : > { %s1890_s22 = scalar_lea.hbm %s2304_s9, 32 }
 0x9de   : > { %p1891_p1 = scmp.ne.s32.totalorder %s2304_s9, %s1890_s22  ;;  %p1896_p4 = scmp.lt.u32.totalorder %s1890_s22, %s2304_s9 }
 0x9e0   : > { %p1892_p2 = pnand %p1891_p1, %p2260_p7 }
 0x9e2   : > { %p1893_p3 = pneg %p1892_p2 }
 0x9e4   : > { %p1898_p5 = pnand %p1896_p4, %p1893_p3 }
 0x9e6   : > { %1901 = shalt.err (!%p1898_p5)
}
 0x9e7   : > { %1800 = dma.vmem_to_hbm [thread:$0]  (%p2260_p7), %s1451_s17, 32, %s2304_s9, [#allocation5]  }
 0x9e8   : > { %1921 = dma.done.wait (%p2260_p7), [#allocation5], 32  }
 0x9e9   : > { %1923 = vsyncadd (%p2260_p7), [#allocation5], 4294967264 }
 0x9ea PF: > { %s20_s11 = sadd.s32 1, %s1934_s11   ;;  %s2308_s24 = sld [smem:[#allocation19_spill]] }
 0x9eb   : > { %p17_p6 = scmp.ge.s32.totalorder %s20_s11, 4   ;;  %s2309_s30 = smov %s1930_s10 }
 0x9ed   :  { %19 = sbr.rel (!%p17_p6) target bundleno = 2 (0x2), region = 224 }
 0x9f0   : > { %s2310_s10 = smov %s2308_s24 }
 0x9f4   :  { %1463 = vsyncpa [#allocation5], 1 }
 0x9f5   :  { %1465 = vsyncpa [#allocation5 + $0x1], 1 }

</bundles_post_ra>
